<compile_context>
chip_gen: v5e
topology: v5e:2x2
jax: 0.10.0
libtpu: 0.0.40
codegen_flags: <defaults>
</compile_context>

<pallas_src>
import functools

import jax
import jax.numpy as jnp
from jax.experimental import pallas as pl
from jax.experimental.pallas import tpu as pltpu


# ---------------------------------------------------------------------------
# Stage 1 (parallel): XW = x @ W_ih + b  over all S*B rows in one big matmul.
# ---------------------------------------------------------------------------
def _input_proj_kernel(x_ref, w_ref, b_ref, o_ref):
    # Native-dtype operands straight into the MXU, f32 accumulation.
    o_ref[...] = (
        jnp.dot(x_ref[...], w_ref[...], preferred_element_type=jnp.float32)
        + b_ref[...]
    )


def _row_tile(m, cap=512):
    """Largest row tile <= cap that divides m and is 8-aligned (or m itself)."""
    if m <= cap:
        return m
    tm = (cap // 8) * 8
    while tm >= 8:
        if m % tm == 0:
            return tm
        tm -= 8
    return m


def _input_projection(x2d, w_ih, b):
    M, D_in = x2d.shape
    H = w_ih.shape[1]
    tm = _row_tile(M)
    return pl.pallas_call(
        _input_proj_kernel,
        out_shape=jax.ShapeDtypeStruct((M, H), jnp.float32),
        grid_spec=pltpu.PrefetchScalarGridSpec(
            num_scalar_prefetch=0,
            grid=(M // tm,),
            in_specs=[
                pl.BlockSpec((tm, D_in), lambda i: (i, 0)),
                pl.BlockSpec((D_in, H), lambda i: (0, 0)),   # resident weight
                pl.BlockSpec((1, H), lambda i: (0, 0)),      # resident bias
            ],
            out_specs=pl.BlockSpec((tm, H), lambda i: (i, 0)),
        ),
        compiler_params=pltpu.CompilerParams(
            dimension_semantics=("parallel",),
        ),
    )(x2d, w_ih, b)


# ---------------------------------------------------------------------------
# Stage 2 (serial): h_t = tanh(XW[t] + h_{t-1} @ W_hh), time loop inside kernel.
# ---------------------------------------------------------------------------
def _recurrence_kernel(xw_ref, whh_ref, out_ref, h_scratch, *, t_chunk, unroll):
    # Hidden state persists across chunks in VMEM scratch; zero it once.
    @pl.when(pl.program_id(0) == 0)
    def _():
        h_scratch[...] = jnp.zeros_like(h_scratch)

    # Hoist the weight load out of the time loop (lives in vregs for the chunk).
    whh = whh_ref[...]

    def body(t, h):
        h_new = jnp.tanh(
            xw_ref[t] + jnp.dot(h, whh, preferred_element_type=jnp.float32)
        )
        out_ref[t] = h_new.astype(out_ref.dtype)
        return h_new

    h_last = jax.lax.fori_loop(0, t_chunk, body, h_scratch[...], unroll=unroll)
    h_scratch[...] = h_last


def _pick_t_chunk(S, B, H, budget_bytes=8 << 20):
    """Largest divisor of S whose (double-buffered) xw+out chunk fits the budget."""
    per_step = 4 * B * H * 4            # xw chunk + out chunk, 2x buffered, f32
    tc = max(1, min(S, budget_bytes // max(per_step, 1)))
    while S % tc != 0:
        tc -= 1
    return tc


def rnn_forward(x, w_ih, w_hh, b, *, t_chunk=None):
    """x: (S, B, D_in); w_ih: (D_in, H); w_hh: (H, H); b: (1, H) -> (S, B, H)."""
    S, B, D_in = x.shape
    H = w_hh.shape[0]

    # Stage 1: big parallel matmul (bias folded in), kept in f32 for the recurrence.
    xw = _input_projection(x.reshape(S * B, D_in), w_ih, b).reshape(S, B, H)

    # Stage 2: chunked serial recurrence.
    if t_chunk is None:
        t_chunk = _pick_t_chunk(S, B, H)
    n_chunks = S // t_chunk
    unroll = t_chunk <= 16

    return pl.pallas_call(
        functools.partial(_recurrence_kernel, t_chunk=t_chunk, unroll=unroll),
        out_shape=jax.ShapeDtypeStruct((S, B, H), x.dtype),
        grid_spec=pltpu.PrefetchScalarGridSpec(
            num_scalar_prefetch=0,
            grid=(n_chunks,),
            in_specs=[
                pl.BlockSpec((t_chunk, B, H), lambda c: (c, 0, 0)),  # XW chunk
                pl.BlockSpec((H, H), lambda c: (0, 0)),              # W_hh resident
            ],
            out_specs=pl.BlockSpec((t_chunk, B, H), lambda c: (c, 0, 0)),
            scratch_shapes=[pltpu.VMEM((B, H), jnp.float32)],        # carried hidden
        ),
        compiler_params=pltpu.CompilerParams(
            # time axis is a sequential recurrence -> must stay "arbitrary"
            dimension_semantics=("arbitrary",),
        ),
    )(xw, w_hh)


# ---------------------------------------------------------------------------
# Pure-JAX reference (lax.scan) for correctness checking.
# ---------------------------------------------------------------------------
def rnn_reference(x, w_ih, w_hh, b):
    def step(h, x_t):
        h_new = jnp.tanh(x_t @ w_ih + h @ w_hh + b)
        return h_new, h_new

    B = x.shape[1]
    H = w_hh.shape[0]
    h0 = jnp.zeros((B, H), jnp.float32)
    _, hs = jax.lax.scan(step, h0, x.astype(jnp.float32))
    return hs.astype(x.dtype)


if __name__ == "__main__":
    # Small, MXU/VPU-friendly shapes.
    S, B, D_in, H = 8, 8, 128, 128

    key = jax.random.PRNGKey(0)
    kx, kwi, kwh, kb = jax.random.split(key, 4)

    x = jax.random.normal(kx, (S, B, D_in), dtype=jnp.float32)
    # Deterministic parameter init (uniform, PyTorch-RNN-style scale 1/sqrt(H)).
    scale = 1.0 / jnp.sqrt(jnp.float32(H))
    w_ih = jax.random.uniform(kwi, (D_in, H), jnp.float32, -scale, scale)
    w_hh = jax.random.uniform(kwh, (H, H), jnp.float32, -scale, scale)
    b = jax.random.uniform(kb, (1, H), jnp.float32, -scale, scale)

    out = jax.block_until_ready(rnn_forward(x, w_ih, w_hh, b))

    ref = jax.block_until_ready(rnn_reference(x, w_ih, w_hh, b))
    assert out.shape == (S, B, H)
    assert jnp.allclose(out, ref, atol=2e-5, rtol=2e-5), "mismatch vs JAX reference"

    print("KERNEL_OK")
</pallas_src>

<mosaic_0001>
module attributes {stable_mosaic.version = 11 : i64} {
  func.func @_input_proj_kernel(%arg0: i32, %arg1: memref<64x128xf32, #tpu.memory_space<vmem>>, %arg2: memref<128x128xf32, #tpu.memory_space<vmem>>, %arg3: memref<1x128xf32, #tpu.memory_space<vmem>>, %arg4: memref<64x128xf32, #tpu.memory_space<vmem>>) attributes {dimension_semantics = [#tpu.dimension_semantics<parallel>], iteration_bounds = array<i64: 1>, scalar_prefetch = 0 : i64, scratch_operands = 0 : i64, tpu.core_type = #tpu.core_type<tc>, window_params = [{transform_indices = @transform_0, window_bounds = array<i64: 64, 128>}, {pipeline_mode = #tpu.pipeline_mode<synchronous>, transform_indices = @transform_1, window_bounds = array<i64: 128, 128>}, {pipeline_mode = #tpu.pipeline_mode<synchronous>, transform_indices = @transform_2, window_bounds = array<i64: 1, 128>}, {transform_indices = @transform_3, window_bounds = array<i64: 64, 128>}]} {
    %c0 = arith.constant 0 : index
    %c0_0 = arith.constant 0 : index
    %0 = vector.load %arg1[%c0, %c0_0] : memref<64x128xf32, #tpu.memory_space<vmem>>, vector<64x128xf32>
    %c0_1 = arith.constant 0 : index
    %c0_2 = arith.constant 0 : index
    %1 = vector.load %arg2[%c0_1, %c0_2] : memref<128x128xf32, #tpu.memory_space<vmem>>, vector<128x128xf32>
    %cst = arith.constant dense<0.000000e+00> : vector<64x128xf32>
    %2 = tpu.matmul %0, %1, %cst {dimension_numbers = #tpu.dot_dimension_numbers<[1], [0], [0], [1], [0, 0, 1, 1], [], []>} : vector<64x128xf32>, vector<128x128xf32>, vector<64x128xf32> -> vector<64x128xf32>
    %c0_3 = arith.constant 0 : index
    %c0_4 = arith.constant 0 : index
    %3 = vector.load %arg3[%c0_3, %c0_4] : memref<1x128xf32, #tpu.memory_space<vmem>>, vector<1x128xf32>
    %4 = vector.broadcast %3 : vector<1x128xf32> to vector<64x128xf32>
    %5 = arith.addf %2, %4 : vector<64x128xf32>
    %c0_5 = arith.constant 0 : index
    %c0_6 = arith.constant 0 : index
    %6 = vector.load %arg4[%c0_5, %c0_6] : memref<64x128xf32, #tpu.memory_space<vmem>>, vector<64x128xf32>
    tpu.vector_store %arg4[%c0_5, %c0_6], %5 {strides = array<i32>} : memref<64x128xf32, #tpu.memory_space<vmem>>, vector<64x128xf32>,
    return
  }
  func.func @transform_0(%arg0: i32) -> (i32, i32) {
    %c0_i32 = arith.constant 0 : i32
    %c0_i32_0 = arith.constant 0 : i32
    return %arg0, %c0_i32 : i32, i32
  }
  func.func @transform_1(%arg0: i32) -> (i32, i32) {
    %c0_i32 = arith.constant 0 : i32
    %c0_i32_0 = arith.constant 0 : i32
    %c0_i32_1 = arith.constant 0 : i32
    return %c0_i32, %c0_i32_0 : i32, i32
  }
  func.func @transform_2(%arg0: i32) -> (i32, i32) {
    %c0_i32 = arith.constant 0 : i32
    %c0_i32_0 = arith.constant 0 : i32
    %c0_i32_1 = arith.constant 0 : i32
    return %c0_i32, %c0_i32_0 : i32, i32
  }
  func.func @transform_3(%arg0: i32) -> (i32, i32) {
    %c0_i32 = arith.constant 0 : i32
    %c0_i32_0 = arith.constant 0 : i32
    return %arg0, %c0_i32 : i32, i32
  }
}

</mosaic_0001>

<bundles_post_ra>
// kernel: tpu_custom_call.1
= control target key start
LH: loop header
LB: loop body
LE: loop exit
PB: predicated region body
PF: predicated region fallthrough
CT: control target
= control target key end

     0   :  { %8 = vsyncpa [#allocation3], 0  ;;  %s322_s0 = inlined_call_operand.hbm [shape: f32[64,128], index: 0, kind: input, shape index: {}]   ;;  %s323_s1 = inlined_call_operand.hbm [shape: f32[128,128], index: 1, kind: input, shape index: {}]   ;;  %s324_s2 = inlined_call_operand.vmem [shape: f32[1,128], index: 2, kind: input, shape index: {}]   ;;  %s325_s3 = inlined_call_operand.hbm [shape: f32[64,128], index: 3, kind: output, shape index: {}]  }
   0x1   :  { %9 = vsyncpa [#allocation6], 0 }
   0x2   :  { %10 = vsyncpa [#allocation4], 0  ;;  %s15_s14 = sshll.u32 %s322_s0, 4  ;;  %s276_s15 = smov [#allocation2]   ;;  %s16_s14 = int_to_ptr.hbm [resolvable:$true] %s15_s14 }
   0x3   :  { %s17_s16 = sshll.u32 %s276_s15, 4  ;;  %s28_s19 = sshll.u32 %s323_s1, 4  ;;  %s18_s16 = int_to_ptr.vmem [resolvable:$true] %s17_s16  ;;  %s29_s19 = int_to_ptr.hbm [resolvable:$true] %s28_s19 }
   0x4   :  { %s277_s20 = smov 128   ;;  %s278_s21 = smov 8  }
   0x5   :  { %23 = dma.hbm_to_vmem [thread:$0]  %s16_s14, 1024, %s18_s16, [#allocation3], %s277_s20, %s277_s20, %s278_s21  }
   0x6   :  { %s279_s22 = smov [#allocation5]  }
   0x7   :  { %s30_s23 = sshll.u32 %s279_s22, 4  ;;  %s31_s23 = int_to_ptr.vmem [resolvable:$true] %s30_s23 }
   0x8   :  { %36 = dma.hbm_to_vmem [thread:$0]  %s29_s19, 2048, %s31_s23, [#allocation6], %s277_s20, %s277_s20, %s278_s21  }
   0x9   :  { %270 = dma.done.wait [#allocation3], 1024  }
   0xa   :  { %271 = vsyncadd [#allocation3], 4294966272 }
   0xb   :  { %272 = dma.done.wait [#allocation6], 2048  }
   0xc   :  { %273 = vsyncadd [#allocation6], 4294965248  ;;  %v70_v0 = vld [vmem:[#allocation5 + $0x78] sm:$0xff]  ;;  %v69_v1 = vld [vmem:[#allocation5 + $0x70] sm:$0xff]  ;;  %s280_s24 = smov [#allocation7]   ;;  %s130_s27 = sshll.u32 %s325_s3, 4  ;;  %s131_s27 = int_to_ptr.hbm [resolvable:$true] %s130_s27 }
   0xd   :  { %145 = vmatpush.msra.mxu2 %v70_v0  ;;  %146 = vmatpush.msra.mxu3 %v70_v0  ;;  %v68_v2 = vld [vmem:[#allocation5 + $0x68] sm:$0xff]  ;;  %v67_v3 = vld [vmem:[#allocation5 + $0x60] sm:$0xff]  ;;  %v66_v4 = vld [vmem:[#allocation5 + $0x58] sm:$0xff]  ;;  %s128_s25 = sshll.u32 %s280_s24, 4  ;;  %s129_s25 = int_to_ptr.vmem [resolvable:$true] %s128_s25 }
   0xe   :  { %75 = vmatpush.msra.mxu0 %v70_v0  ;;  %144 = vmatpush.msra.mxu1 %v70_v0  ;;  %v65_v5 = vld [vmem:[#allocation5 + $0x50] sm:$0xff]  ;;  %v64_v6 = vld [vmem:[#allocation5 + $0x48] sm:$0xff]  ;;  %v63_v7 = vld [vmem:[#allocation5 + $0x40] sm:$0xff] }
   0xf   :  { %148 = vmatpush.msra.mxu2 %v69_v1  ;;  %149 = vmatpush.msra.mxu3 %v69_v1  ;;  %v62_v8 = vld [vmem:[#allocation5 + $0x38] sm:$0xff]  ;;  %v61_v9 = vld [vmem:[#allocation5 + $0x30] sm:$0xff]  ;;  %v60_v10 = vld [vmem:[#allocation5 + $0x28] sm:$0xff] }
  0x10   :  { %76 = vmatpush.msra.mxu0 %v69_v1  ;;  %147 = vmatpush.msra.mxu1 %v69_v1  ;;  %v59_v11 = vld [vmem:[#allocation5 + $0x20] sm:$0xff]  ;;  %v58_v12 = vld [vmem:[#allocation5 + $0x18] sm:$0xff]  ;;  %v57_v13 = vld [vmem:[#allocation5 + $0x10] sm:$0xff] }
  0x11   :  { %151 = vmatpush.msra.mxu2 %v68_v2  ;;  %152 = vmatpush.msra.mxu3 %v68_v2  ;;  %v56_v14 = vld [vmem:[#allocation5 + $0x8] sm:$0xff]  ;;  %v55_v15 = vld [vmem:[#allocation5] sm:$0xff]  ;;  %v53_v17 = vld [vmem:[#allocation2 + $0x30] sm:$0xff] }
  0x12   :  { %77 = vmatpush.msra.mxu0 %v68_v2  ;;  %150 = vmatpush.msra.mxu1 %v68_v2  ;;  %v51_v16 = vld [vmem:[#allocation2 + $0x20] sm:$0xff]  ;;  %v49_v19 = vld [vmem:[#allocation2 + $0x10] sm:$0xff]  ;;  %v52_v20 = vld [vmem:[#allocation2 + $0x28] sm:$0xff] }
  0x13   :  { %154 = vmatpush.msra.mxu2 %v67_v3  ;;  %155 = vmatpush.msra.mxu3 %v67_v3  ;;  %v47_v18 = vld [vmem:[#allocation2] sm:$0xff]  ;;  %v54_v21 = vld [vmem:[#allocation2 + $0x38] sm:$0xff]  ;;  %v48_v22 = vld [vmem:[#allocation2 + $0x8] sm:$0xff] }
  0x14   :  { %78 = vmatpush.msra.mxu0 %v67_v3  ;;  %153 = vmatpush.msra.mxu1 %v67_v3  ;;  %v50_v23 = vld [vmem:[#allocation2 + $0x18] sm:$0xff]  ;;  %v197_v24 = vld [vmem:[%s324_s2] ss:$0 sm:$0xff] }
  0x15   :  { %157 = vmatpush.msra.mxu2 %v66_v4  ;;  %158 = vmatpush.msra.mxu3 %v66_v4 }
  0x16   :  { %79 = vmatpush.msra.mxu0 %v66_v4  ;;  %156 = vmatpush.msra.mxu1 %v66_v4 }
  0x17   :  { %160 = vmatpush.msra.mxu2 %v65_v5  ;;  %161 = vmatpush.msra.mxu3 %v65_v5 }
  0x18   :  { %80 = vmatpush.msra.mxu0 %v65_v5  ;;  %159 = vmatpush.msra.mxu1 %v65_v5 }
  0x19   :  { %163 = vmatpush.msra.mxu2 %v64_v6  ;;  %164 = vmatpush.msra.mxu3 %v64_v6 }
  0x1a   :  { %81 = vmatpush.msra.mxu0 %v64_v6  ;;  %162 = vmatpush.msra.mxu1 %v64_v6 }
  0x1b   :  { %166 = vmatpush.msra.mxu2 %v63_v7  ;;  %167 = vmatpush.msra.mxu3 %v63_v7 }
  0x1c   :  { %82 = vmatpush.msra.mxu0 %v63_v7  ;;  %165 = vmatpush.msra.mxu1 %v63_v7 }
  0x1d   :  { %169 = vmatpush.msra.mxu2 %v62_v8  ;;  %170 = vmatpush.msra.mxu3 %v62_v8 }
  0x1e   :  { %83 = vmatpush.msra.mxu0 %v62_v8  ;;  %168 = vmatpush.msra.mxu1 %v62_v8 }
  0x1f   :  { %172 = vmatpush.msra.mxu2 %v61_v9  ;;  %173 = vmatpush.msra.mxu3 %v61_v9 }
  0x20   :  { %84 = vmatpush.msra.mxu0 %v61_v9  ;;  %171 = vmatpush.msra.mxu1 %v61_v9 }
  0x21   :  { %175 = vmatpush.msra.mxu2 %v60_v10  ;;  %176 = vmatpush.msra.mxu3 %v60_v10 }
  0x22   :  { %85 = vmatpush.msra.mxu0 %v60_v10  ;;  %174 = vmatpush.msra.mxu1 %v60_v10 }
  0x23   :  { %178 = vmatpush.msra.mxu2 %v59_v11  ;;  %179 = vmatpush.msra.mxu3 %v59_v11 }
  0x24   :  { %86 = vmatpush.msra.mxu0 %v59_v11  ;;  %177 = vmatpush.msra.mxu1 %v59_v11 }
  0x25   :  { %181 = vmatpush.msra.mxu2 %v58_v12  ;;  %182 = vmatpush.msra.mxu3 %v58_v12 }
  0x26   :  { %87 = vmatpush.msra.mxu0 %v58_v12  ;;  %180 = vmatpush.msra.mxu1 %v58_v12 }
  0x27   :  { %184 = vmatpush.msra.mxu2 %v57_v13  ;;  %185 = vmatpush.msra.mxu3 %v57_v13 }
  0x28   :  { %88 = vmatpush.msra.mxu0 %v57_v13  ;;  %183 = vmatpush.msra.mxu1 %v57_v13 }
  0x29   :  { %187 = vmatpush.msra.mxu2 %v56_v14  ;;  %188 = vmatpush.msra.mxu3 %v56_v14 }
  0x2a   :  { %89 = vmatpush.msra.mxu0 %v56_v14  ;;  %186 = vmatpush.msra.mxu1 %v56_v14 }
  0x2b   :  { %190 = vmatpush.msra.mxu2 %v55_v15  ;;  %191 = vmatpush.msra.mxu3 %v55_v15 }
  0x2c   :  { %103 = vmatmul.f32.vlgmr.msra.gmra.mxu2 %v51_v16  ;;  %109 = vmatmul.f32.vlgmr.msra.gmra.mxu3 %v53_v17 }
  0x2d   :  { %90 = vmatpush.msra.mxu0 %v55_v15  ;;  %189 = vmatpush.msra.mxu1 %v55_v15 }
  0x2e   :  { %91 = vmatmul.f32.vlgmr.msra.gmra.mxu0 %v47_v18  ;;  %97 = vmatmul.f32.vlgmr.msra.gmra.mxu1 %v49_v19 }
  0x34   :  { %106 = vmatmul.f32.gmra.mxu2 %v52_v20  ;;  %112 = vmatmul.f32.gmra.mxu3 %v54_v21 }
  0x36   :  { %94 = vmatmul.f32.gmra.mxu0 %v48_v22  ;;  %100 = vmatmul.f32.gmra.mxu1 %v50_v23 }
  0xab   :  { %v92_v25 = vpop.f32.mrf.mxu0  ;;  %v98_v26 = vpop.f32.mrf.mxu1 }
  0xac   :  { %v93_v27 = vadd.f32 %v197_v24, %v92_v25  ;;  %v99_v28 = vadd.f32 %v197_v24, %v98_v26 }
  0xae   :  { %116 = vst [vmem:[#allocation7] sm:$0xff] %v93_v27 }
  0xaf   :  { %118 = vst [vmem:[#allocation7 + $0x10] sm:$0xff] %v99_v28  ;;  %v104_v29 = vpop.f32.mrf.mxu2  ;;  %v110_v30 = vpop.f32.mrf.mxu3 }
  0xb0   :  { %v105_v31 = vadd.f32 %v197_v24, %v104_v29  ;;  %v111_v32 = vadd.f32 %v197_v24, %v110_v30 }
  0xb2   :  { %120 = vst [vmem:[#allocation7 + $0x20] sm:$0xff] %v105_v31 }
  0xb3   :  { %122 = vst [vmem:[#allocation7 + $0x30] sm:$0xff] %v111_v32  ;;  %v95_v33 = vpop.f32.mrf.mxu0  ;;  %v101_v34 = vpop.f32.mrf.mxu1 }
  0xb4   :  { %v96_v35 = vadd.f32 %v197_v24, %v95_v33  ;;  %v102_v36 = vadd.f32 %v197_v24, %v101_v34 }
  0xb6   :  { %117 = vst [vmem:[#allocation7 + $0x8] sm:$0xff] %v96_v35 }
  0xb7   :  { %119 = vst [vmem:[#allocation7 + $0x18] sm:$0xff] %v102_v36  ;;  %v107_v37 = vpop.f32.mrf.mxu2  ;;  %v113_v38 = vpop.f32.mrf.mxu3 }
  0xb8   :  { %v108_v39 = vadd.f32 %v197_v24, %v107_v37  ;;  %v114_v40 = vadd.f32 %v197_v24, %v113_v38 }
  0xba   :  { %121 = vst [vmem:[#allocation7 + $0x28] sm:$0xff] %v108_v39 }
  0xbb   :  { %123 = vst [vmem:[#allocation7 + $0x38] sm:$0xff] %v114_v40 }
  0xbc   :  { %136 = dma.vmem_to_hbm [thread:$0]  %s129_s25, 1024, %s131_s27, [#allocation4], %s277_s20, %s277_s20, %s278_s21  }
  0xbd   :  { %274 = dma.done.wait [#allocation4], 1024  }
  0xbe   :  { %275 = vsyncadd [#allocation4], 4294966272 }
  0xbf   :  { %141 = vsyncpa [#allocation3], 1 }
  0xc0   :  { %142 = vsyncpa [#allocation6], 1 }
  0xc1   :  { %143 = vsyncpa [#allocation4], 1 }

</bundles_post_ra>
